<compile_context>
chip_gen: v7x
topology: tpu7x:2x2x1
jax: 0.10.0
libtpu: 0.0.40
codegen_flags: <defaults>
</compile_context>

<pallas_src>
import functools

import jax
import jax.numpy as jnp
from jax import lax
from jax.experimental import pallas as pl
from jax.experimental.pallas import tpu as pltpu


def _round_up(x: int, m: int) -> int:
    return -(-x // m) * m


def _lai_mse_kernel(yp_ref, yt_ref, out_ref, acc_ref, *,
                    factor, coef, R, F, TR, TC):
    i = pl.program_id(0)          # row-block index ('parallel')
    j = pl.program_id(1)          # column-block index (reduction, 'arbitrary')
    nrows = pl.num_programs(0)
    ncols = pl.num_programs(1)

    @pl.when(j == 0)
    def _():
        acc_ref[...] = jnp.zeros_like(acc_ref)

    # Cast on load (free on VPU); inputs stream in native dtype.
    r = yp_ref[...].astype(jnp.float32) - yt_ref[...].astype(jnp.float32)
    mse = r * r
    k_sq = jnp.float32(coef) * mse              # (2r/n)^2 == (4/n^2) * r^2
    a = 1.0 + k_sq
    inv = pl.reciprocal(a, approx=True)         # EUP slot (effectively free)
    inv = inv * (2.0 - a * inv)                 # one Newton-Raphson refinement
    if factor >= 1.0:
        weight = jnp.maximum(k_sq, jnp.float32(factor)) * inv
    else:
        weight = jnp.maximum(k_sq * jnp.float32(1.0 / factor), 1.0) * inv
    val = mse * weight                          # (TR, TC)

    def _fold(v):
        # Fold (TR, TC) -> (TR, min(TC,128)) by summing 128-wide lane groups.
        if TC > 128:
            s = v[:, 0:128]
            for b in range(1, TC // 128):
                s = s + v[:, b * 128:(b + 1) * 128]
            return s
        return v

    ragged_rows = (R % TR) != 0
    ragged_cols = (F % TC) != 0

    if ragged_rows or ragged_cols:
        # Only boundary blocks pay the mask (iota/compare/select) cost.
        cond = None
        if ragged_rows:
            cond = i == nrows - 1
        if ragged_cols:
            c = j == ncols - 1
            cond = c if cond is None else jnp.logical_or(cond, c)

        @pl.when(cond)
        def _():
            mask = None
            if ragged_rows:
                rows = lax.broadcasted_iota(jnp.int32, (TR, TC), 0) + i * TR
                mask = rows < R
            if ragged_cols:
                cols = lax.broadcasted_iota(jnp.int32, (TR, TC), 1) + j * TC
                cmask = cols < F
                mask = cmask if mask is None else (mask & cmask)
            acc_ref[...] += _fold(jnp.where(mask, val, 0.0))

        @pl.when(jnp.logical_not(cond))
        def _():
            acc_ref[...] += _fold(val)
    else:
        acc_ref[...] += _fold(val)

    # Once per row-block: emit the (TR, 128)-wide partial tile.
    @pl.when(j == ncols - 1)
    def _():
        out_ref[...] = acc_ref[...]


def lai_mse(y_pred, y_true, factor: float = 0.5):
    """Adaptive MSE loss (LaiMSE.forward) — returns a scalar f32."""
    assert y_pred.shape == y_true.shape
    n = y_pred.shape[0]                  # batch size used in k_i = 2*r/n
    count = y_pred.size                  # total elements (for .mean())

    # Flatten to a 2-D slab without changing dtype (no host-side upcast/pad).
    yp = jnp.reshape(jnp.asarray(y_pred), (n, -1))
    yt = jnp.reshape(jnp.asarray(y_true), (n, -1))
    R, F = yp.shape

    # Sublane tile for the narrowest streamed dtype (8 f32 / 16 bf16 / 32 i8).
    itemsize = min(jnp.dtype(yp.dtype).itemsize, jnp.dtype(yt.dtype).itemsize)
    itemsize = min(max(itemsize, 1), 4)
    sub = max(8, 32 // itemsize)

    # Row block: large, but guarantee >= 2 row blocks when R allows it so the
    # 'parallel' axis spans both TensorCores on v7x.
    if R < sub:
        TR = R                           # tiny dim: must use full extent
    else:
        TR = min(256, _round_up(-(-R // 2), sub))

    # Column block: large (up to 2048 lanes) and 128-aligned.
    if F < 128:
        TC = F                           # tiny dim: must use full extent
    else:
        TC = min(2048, _round_up(F, 128))

    Gr = -(-R // TR)
    Gc = -(-F // TC)
    W = min(TC, 128)                     # width of per-row-block partial tile

    coef = 4.0 / (float(n) * float(n))
    kernel = functools.partial(_lai_mse_kernel, factor=float(factor),
                               coef=coef, R=R, F=F, TR=TR, TC=TC)

    partials = pl.pallas_call(
        kernel,
        out_shape=jax.ShapeDtypeStruct((Gr * TR, W), jnp.float32),
        grid_spec=pltpu.PrefetchScalarGridSpec(
            num_scalar_prefetch=0,
            grid=(Gr, Gc),
            in_specs=[
                pl.BlockSpec((TR, TC), lambda i, j: (i, j)),
                pl.BlockSpec((TR, TC), lambda i, j: (i, j)),
            ],
            out_specs=pl.BlockSpec((TR, W), lambda i, j: (i, 0)),
            scratch_shapes=[pltpu.VMEM((TR, W), jnp.float32)],
        ),
        compiler_params=pltpu.CompilerParams(
            dimension_semantics=("parallel", "arbitrary")
        ),
    )(yp, yt)

    # Tiny final reduce of the per-row-block partial tiles (padded rows are 0).
    return jnp.sum(partials) / jnp.float32(count)


def _lai_mse_ref(y_pred, y_true, factor=0.5):
    """Pure-JAX reference mirroring the PyTorch forward."""
    yp = jnp.asarray(y_pred, jnp.float32)
    yt = jnp.asarray(y_true, jnp.float32)
    r = yp - yt
    n = yp.shape[0]
    mse_term = r ** 2
    k_i = 2.0 * r / n
    k_i_sq = k_i ** 2
    if factor >= 1.0:
        term1 = k_i_sq / (1.0 + k_i_sq)
        term2 = factor / (1.0 + k_i_sq)
    else:
        term1 = k_i_sq / (factor * (1.0 + k_i_sq))
        term2 = 1.0 / (1.0 + k_i_sq)
    weight = jnp.maximum(term1, term2)
    return jnp.mean(mse_term * weight)


if __name__ == "__main__":
    key = jax.random.PRNGKey(0)
    k1, k2 = jax.random.split(key)
    # (N, C, H, W) style inputs, as the loss accepts any (N, *) shape.
    x_shape = (2, 4, 16, 16)
    y_pred = jax.random.normal(k1, x_shape, dtype=jnp.float32)
    y_true = jax.random.normal(k2, x_shape, dtype=jnp.float32)

    loss = lai_mse(y_pred, y_true, factor=0.5)
    loss = jax.block_until_ready(loss)

    ref = _lai_mse_ref(y_pred, y_true, factor=0.5)
    assert jnp.allclose(loss, ref, rtol=1e-5, atol=1e-6), (loss, ref)
    print("KERNEL_OK")
</pallas_src>

<mosaic_0001>
module attributes {stable_mosaic.version = 11 : i64} {
  func.func @_lai_mse_kernel(%arg0: i32, %arg1: i32, %arg2: memref<2x1024xf32, #tpu.memory_space<vmem>>, %arg3: memref<2x1024xf32, #tpu.memory_space<vmem>>, %arg4: memref<2x128xf32, #tpu.memory_space<vmem>>, %arg5: memref<2x128xf32, #tpu.memory_space<vmem>>) attributes {dimension_semantics = [#tpu.dimension_semantics<parallel>, #tpu.dimension_semantics<arbitrary>], iteration_bounds = array<i64: 1, 1>, scalar_prefetch = 0 : i64, scratch_operands = 1 : i64, tpu.core_type = #tpu.core_type<tc>, window_params = [{transform_indices = @transform_0, window_bounds = array<i64: 2, 1024>}, {transform_indices = @transform_1, window_bounds = array<i64: 2, 1024>}, {transform_indices = @transform_2, window_bounds = array<i64: 2, 128>}]} {
    %c0_i32 = arith.constant 0 : i32
    %0 = arith.cmpi eq, %arg1, %c0_i32 : i32
    %1 = arith.extui %0 : i1 to i32
    %c0_i32_0 = arith.constant 0 : i32
    %2 = arith.cmpi ne, %1, %c0_i32_0 : i32
    scf.if %2 {
      %cst_14 = arith.constant 0.000000e+00 : f32
      %43 = vector.broadcast %cst_14 : f32 to vector<2x128xf32>
      %c0_15 = arith.constant 0 : index
      %c0_16 = arith.constant 0 : index
      %44 = vector.load %arg5[%c0_15, %c0_16] : memref<2x128xf32, #tpu.memory_space<vmem>>, vector<2x128xf32>
      tpu.vector_store %arg5[%c0_15, %c0_16], %43 {strides = array<i32>} : memref<2x128xf32, #tpu.memory_space<vmem>>, vector<2x128xf32>,
    } else {
    }
    %c0 = arith.constant 0 : index
    %c0_1 = arith.constant 0 : index
    %3 = vector.load %arg2[%c0, %c0_1] : memref<2x1024xf32, #tpu.memory_space<vmem>>, vector<2x1024xf32>
    %c0_2 = arith.constant 0 : index
    %c0_3 = arith.constant 0 : index
    %4 = vector.load %arg3[%c0_2, %c0_3] : memref<2x1024xf32, #tpu.memory_space<vmem>>, vector<2x1024xf32>
    %5 = arith.subf %3, %4 : vector<2x1024xf32>
    %6 = arith.mulf %5, %5 : vector<2x1024xf32>
    %cst = arith.constant 1.000000e+00 : f32
    %7 = vector.broadcast %cst : f32 to vector<2x1024xf32>
    %8 = arith.mulf %7, %6 : vector<2x1024xf32>
    %cst_4 = arith.constant 1.000000e+00 : f32
    %9 = vector.broadcast %cst_4 : f32 to vector<2x1024xf32>
    %10 = arith.addf %9, %8 : vector<2x1024xf32>
    %11 = tpu.reciprocal %10 {approx = true} : vector<2x1024xf32> -> vector<2x1024xf32>
    %12 = arith.mulf %10, %11 : vector<2x1024xf32>
    %cst_5 = arith.constant 2.000000e+00 : f32
    %13 = vector.broadcast %cst_5 : f32 to vector<2x1024xf32>
    %14 = arith.subf %13, %12 : vector<2x1024xf32>
    %15 = arith.mulf %11, %14 : vector<2x1024xf32>
    %cst_6 = arith.constant 2.000000e+00 : f32
    %16 = vector.broadcast %cst_6 : f32 to vector<2x1024xf32>
    %17 = arith.mulf %8, %16 : vector<2x1024xf32>
    %cst_7 = arith.constant 1.000000e+00 : f32
    %18 = vector.broadcast %cst_7 : f32 to vector<2x1024xf32>
    %19 = arith.maximumf %17, %18 : vector<2x1024xf32>
    %20 = arith.mulf %19, %15 : vector<2x1024xf32>
    %21 = arith.mulf %6, %20 : vector<2x1024xf32>
    %c0_8 = arith.constant 0 : index
    %c0_9 = arith.constant 0 : index
    %22 = vector.load %arg5[%c0_8, %c0_9] : memref<2x128xf32, #tpu.memory_space<vmem>>, vector<2x128xf32>
    %23 = vector.extract_strided_slice %21 {offsets = [0, 0], sizes = [2, 128], strides = [1, 1]} : vector<2x1024xf32> to vector<2x128xf32>
    %24 = vector.extract_strided_slice %21 {offsets = [0, 128], sizes = [2, 128], strides = [1, 1]} : vector<2x1024xf32> to vector<2x128xf32>
    %25 = arith.addf %23, %24 : vector<2x128xf32>
    %26 = vector.extract_strided_slice %21 {offsets = [0, 256], sizes = [2, 128], strides = [1, 1]} : vector<2x1024xf32> to vector<2x128xf32>
    %27 = arith.addf %25, %26 : vector<2x128xf32>
    %28 = vector.extract_strided_slice %21 {offsets = [0, 384], sizes = [2, 128], strides = [1, 1]} : vector<2x1024xf32> to vector<2x128xf32>
    %29 = arith.addf %27, %28 : vector<2x128xf32>
    %30 = vector.extract_strided_slice %21 {offsets = [0, 512], sizes = [2, 128], strides = [1, 1]} : vector<2x1024xf32> to vector<2x128xf32>
    %31 = arith.addf %29, %30 : vector<2x128xf32>
    %32 = vector.extract_strided_slice %21 {offsets = [0, 640], sizes = [2, 128], strides = [1, 1]} : vector<2x1024xf32> to vector<2x128xf32>
    %33 = arith.addf %31, %32 : vector<2x128xf32>
    %34 = vector.extract_strided_slice %21 {offsets = [0, 768], sizes = [2, 128], strides = [1, 1]} : vector<2x1024xf32> to vector<2x128xf32>
    %35 = arith.addf %33, %34 : vector<2x128xf32>
    %36 = vector.extract_strided_slice %21 {offsets = [0, 896], sizes = [2, 128], strides = [1, 1]} : vector<2x1024xf32> to vector<2x128xf32>
    %37 = arith.addf %35, %36 : vector<2x128xf32>
    %38 = arith.addf %22, %37 : vector<2x128xf32>
    %c0_10 = arith.constant 0 : index
    %c0_11 = arith.constant 0 : index
    %39 = vector.load %arg5[%c0_10, %c0_11] : memref<2x128xf32, #tpu.memory_space<vmem>>, vector<2x128xf32>
    tpu.vector_store %arg5[%c0_10, %c0_11], %38 {strides = array<i32>} : memref<2x128xf32, #tpu.memory_space<vmem>>, vector<2x128xf32>,
    %c0_i32_12 = arith.constant 0 : i32
    %40 = arith.cmpi eq, %arg1, %c0_i32_12 : i32
    %41 = arith.extui %40 : i1 to i32
    %c0_i32_13 = arith.constant 0 : i32
    %42 = arith.cmpi ne, %41, %c0_i32_13 : i32
    scf.if %42 {
      %c0_14 = arith.constant 0 : index
      %c0_15 = arith.constant 0 : index
      %43 = vector.load %arg5[%c0_14, %c0_15] : memref<2x128xf32, #tpu.memory_space<vmem>>, vector<2x128xf32>
      %c0_16 = arith.constant 0 : index
      %c0_17 = arith.constant 0 : index
      %44 = vector.load %arg4[%c0_16, %c0_17] : memref<2x128xf32, #tpu.memory_space<vmem>>, vector<2x128xf32>
      tpu.vector_store %arg4[%c0_16, %c0_17], %43 {strides = array<i32>} : memref<2x128xf32, #tpu.memory_space<vmem>>, vector<2x128xf32>,
    } else {
    }
    return
  }
  func.func @transform_0(%arg0: i32, %arg1: i32) -> (i32, i32) {
    %c0_i32 = arith.constant 0 : i32
    return %arg0, %arg1 : i32, i32
  }
  func.func @transform_1(%arg0: i32, %arg1: i32) -> (i32, i32) {
    %c0_i32 = arith.constant 0 : i32
    return %arg0, %arg1 : i32, i32
  }
  func.func @transform_2(%arg0: i32, %arg1: i32) -> (i32, i32) {
    %c0_i32 = arith.constant 0 : i32
    %c0_i32_0 = arith.constant 0 : i32
    return %arg0, %c0_i32 : i32, i32
  }
}

</mosaic_0001>

<bundles_post_ra>
// kernel: tpu_custom_call.1
= control target key start
LH: loop header
LB: loop body
LE: loop exit
PB: predicated region body
PF: predicated region fallthrough
CT: control target
= control target key end

     0   :  { %7 = vsyncpa [#allocation4], 0  ;;  %s247_s0 = inlined_call_operand.hbm [shape: f32[2,1024], index: 0, kind: input, shape index: {}]   ;;  %s248_s1 = inlined_call_operand.hbm [shape: f32[2,1024], index: 1, kind: input, shape index: {}]   ;;  %s249_s2 = inlined_call_operand.hbm [shape: f32[2,128], index: 2, kind: output, shape index: {}]  }
   0x1   :  { %8 = vsyncpa [#allocation7], 0 }
   0x2   :  { %9 = vsyncpa [#allocation5], 0  ;;  %s192_s9 = smov [#allocation3]   ;;  %s193_s11 = smov [#allocation6]  }
   0x3   :  { %s16_s10 = sshll.u32 %s192_s9, 4  ;;  %s26_s12 = sshll.u32 %s193_s11, 4  ;;  %s17_s10 = int_to_ptr.vmem [resolvable:$true] %s16_s10  ;;  %s27_s12 = int_to_ptr.vmem [resolvable:$true] %s26_s12 }
   0x4   :  { %s120_s15 = scalar_lea.hbm %s247_s0, 256 }
   0x5   :  { %p121_p0 = scmp.ne.s32.totalorder %s247_s0, %s120_s15  ;;  %p124_p1 = scmp.lt.u32.totalorder %s120_s15, %s247_s0 }
   0x7   :  { %p126_p2 = pnand %p124_p1, %p121_p0 }
   0x9   :  { %129 = shalt.err (!%p126_p2)
}
   0xa   :  { %s130_s20 = scalar_lea.vmem %s17_s10, 256  ;;  %p135_p4 = scmp.lt.s32.totalorder %s17_s10, %s17_s10 }
   0xb   :  { %p131_p3 = scmp.ne.s32.totalorder %s17_s10, %s130_s20  ;;  %p136_p5 = scmp.lt.s32.totalorder %s130_s20, %s130_s20 }
   0xd   :  { %p137_p6 = por %p136_p5, %p135_p4 }
   0xf   :  { %p138_p7 = pnand %p137_p6, %p131_p3 }
  0x11   :  { %141 = shalt.err (!%p138_p7)
}
  0x12   :  { %19 = dma.hbm_to_vmem [thread:$0]  %s247_s0, 256, %s17_s10, [#allocation4]  }
  0x13   :  { %s142_s25 = scalar_lea.hbm %s248_s1, 256 }
  0x14   :  { %p143_p8 = scmp.ne.s32.totalorder %s248_s1, %s142_s25  ;;  %p146_p9 = scmp.lt.u32.totalorder %s142_s25, %s248_s1 }
  0x16   :  { %p148_p10 = pnand %p146_p9, %p143_p8 }
  0x18   :  { %151 = shalt.err (!%p148_p10)
}
  0x19   :  { %s152_s30 = scalar_lea.vmem %s27_s12, 256  ;;  %p157_p12 = scmp.lt.s32.totalorder %s27_s12, %s27_s12 }
  0x1a   :  { %p153_p11 = scmp.ne.s32.totalorder %s27_s12, %s152_s30  ;;  %p158_p13 = scmp.lt.s32.totalorder %s152_s30, %s152_s30 }
  0x1c   :  { %p159_p0 = por %p158_p13, %p157_p12 }
  0x1e   :  { %p160_p1 = pnand %p159_p0, %p153_p11 }
  0x20   :  { %163 = shalt.err (!%p160_p1)
}
  0x21   :  { %29 = dma.hbm_to_vmem [thread:$0]  %s248_s1, 256, %s27_s12, [#allocation7]  }
  0x22   :  { %186 = dma.done.wait [#allocation4], 256  }
  0x23   :  { %187 = vsyncadd [#allocation4], 4294967040 }
  0x24   :  { %188 = dma.done.wait [#allocation7], 256  }
  0x25   :  { %189 = vsyncadd [#allocation7], 4294967040  ;;  %v194_v0 = vmov 0.0   ;;  %v41_v1 = vld [vmem:[#allocation3] sm:$0xff]  ;;  %v42_v2 = vld [vmem:[#allocation3 + $0x8] sm:$0xff]  ;;  %s195_s1 = smov [#allocation8]  }
  0x26   :  { %40 = vst [vmem:[#allocation2] sm:$0x3] %v194_v0  ;;  %v43_v3 = vld [vmem:[#allocation6] sm:$0xff]  ;;  %v44_v4 = vld [vmem:[#allocation6 + $0x8] sm:$0xff]  ;;  %s102_s4 = sshll.u32 %s195_s1, 4  ;;  %s103_s4 = int_to_ptr.vmem [resolvable:$true] %s102_s4 }
  0x27   :  { %v45_v5 = vsub.f32 %v41_v1, %v43_v3  ;;  %v46_v6 = vsub.f32 %v42_v2, %v44_v4  ;;  %s164_s5 = scalar_lea.vmem %s103_s4, 32  ;;  %p169_p3 = scmp.lt.s32.totalorder %s103_s4, %s103_s4 }
  0x28   :  { %p165_p2 = scmp.ne.s32.totalorder %s103_s4, %s164_s5  ;;  %p170_p4 = scmp.lt.s32.totalorder %s164_s5, %s164_s5 }
  0x29   :  { %v47_v7 = vmul.f32 %v45_v5, %v45_v5  ;;  %v48_v8 = vmul.f32 %v46_v6, %v46_v6 }
  0x2a   :  { %p171_p5 = por %p170_p4, %p169_p3 }
  0x2b   :  { %v49_v9 = vadd.f32 1.0, %v47_v7  ;;  %v50_v10 = vadd.f32 1.0, %v48_v8  ;;  %v59_v11 = vmul.f32 2.0, %v47_v7  ;;  %v60_v15 = vmul.f32 2.0, %v48_v8 }
  0x2c   :  { %p172_p6 = pnand %p171_p5, %p165_p2 }
  0x2d   :  { %116 = vrcp.f32 %v49_v9  ;;  %v61_v18 = vmax.f32 %v59_v11, 1.0  ;;  %v62_v21 = vmax.f32 %v60_v15, 1.0  ;;  %v67_v39 = vld [vmem:[#allocation2] sm:$0x3] }
  0x2e   :  { %118 = vrcp.f32 %v50_v10 }
  0x37   :  { %v117_v12 = vpop.eup %116 }
  0x38   :  { %v119_v13 = vpop.eup %118  ;;  %v53_v14 = vmul.f32 %v117_v12, %v49_v9 }
  0x39   :  { %v54_v16 = vmul.f32 %v119_v13, %v50_v10 }
  0x3a   :  { %v55_v17 = vsub.f32 2.0, %v53_v14 }
  0x3b   :  { %v56_v19 = vsub.f32 2.0, %v54_v16 }
  0x3c   :  { %v57_v20 = vmul.f32 %v117_v12, %v55_v17 }
  0x3d   :  { %v58_v22 = vmul.f32 %v119_v13, %v56_v19 }
  0x3e   :  { %v63_v23 = vmul.f32 %v61_v18, %v57_v20 }
  0x3f   :  { %v64_v24 = vmul.f32 %v62_v21, %v58_v22 }
  0x40   :  { %v65_v25 = vmul.f32 %v63_v23, %v47_v7 }
  0x41   :  { %v66_v28 = vmul.f32 %v64_v24, %v48_v8 }
  0x42   :  { %v69_v26 = vrot.slane %v65_v25, 2  ;;  %v72_v27 = vrot.slane %v65_v25, 4  ;;  %v75_v30 = vrot.slane %v65_v25, 6 }
  0x43   :  { %v80_v33 = vrot.slane %v66_v28, 2  ;;  %v83_v35 = vrot.slane %v66_v28, 4  ;;  %v86_v37 = vrot.slane %v66_v28, 6 }
  0x44   :  { %v71_v29 = vadd.f32 %v69_v26, %v65_v25 }
  0x46   :  { %v74_v31 = vadd.f32 %v72_v27, %v71_v29 }
  0x48   :  { %v77_v32 = vadd.f32 %v75_v30, %v74_v31 }
  0x4a   :  { %v78_v34 = vadd.f32 %v77_v32, %v66_v28 }
  0x4c   :  { %v82_v36 = vadd.f32 %v80_v33, %v78_v34 }
  0x4e   :  { %v85_v38 = vadd.f32 %v83_v35, %v82_v36 }
  0x50   :  { %v88_v40 = vadd.f32 %v86_v37, %v85_v38 }
  0x52   :  { %v89_v41 = vadd.f32 %v88_v40, %v67_v39 }
  0x54   :  { %90 = vst [vmem:[#allocation2] sm:$0x3] %v89_v41 }
  0x5b   :  { %v94_v42 = vld [vmem:[#allocation2] sm:$0x3] }
  0x5c   :  { %95 = vst [vmem:[#allocation8] sm:$0x3] %v94_v42 }
  0x5d   :  { %175 = shalt.err (!%p172_p6)
}
  0x5e   :  { %s176_s8 = scalar_lea.hbm %s249_s2, 32 }
  0x5f   :  { %p177_p7 = scmp.ne.s32.totalorder %s249_s2, %s176_s8  ;;  %p180_p8 = scmp.lt.u32.totalorder %s176_s8, %s249_s2 }
  0x61   :  { %p182_p9 = pnand %p180_p8, %p177_p7 }
  0x63   :  { %185 = shalt.err (!%p182_p9)
}
  0x64   :  { %105 = dma.vmem_to_hbm [thread:$0]  %s103_s4, 32, %s249_s2, [#allocation5]  }
  0x65   :  { %190 = dma.done.wait [#allocation5], 32  }
  0x66   :  { %191 = vsyncadd [#allocation5], 4294967264 }
  0x67   :  { %109 = vsyncpa [#allocation4], 1 }
  0x68   :  { %110 = vsyncpa [#allocation7], 1 }
  0x69   :  { %111 = vsyncpa [#allocation5], 1 }

</bundles_post_ra>
